<compile_context>
chip_gen: v5e
topology: v5e:2x2
jax: 0.10.0
libtpu: 0.0.40
codegen_flags: <defaults>
</compile_context>

<pallas_src>
import functools

import numpy as np

import jax
import jax.numpy as jnp
from jax import lax
from jax.experimental import pallas as pl
from jax.experimental.pallas import tpu as pltpu


# ---------------------------------------------------------------------------
# Tile selection: biggest tile <= preferred; pad (never whole-dim fallback)
# ---------------------------------------------------------------------------
def _tile_and_pad(dim, preferred):
    """Return (tile, padded_dim).  `preferred` must be (8,128)-friendly."""
    if dim <= preferred:
        return dim, dim                      # full-dim block is always legal
    if dim % preferred == 0:
        return preferred, dim
    return preferred, pl.cdiv(dim, preferred) * preferred


# ---------------------------------------------------------------------------
# Tiled, pipelined linear kernel:  o = x @ w + b
# ---------------------------------------------------------------------------
def _linear_kernel(x_ref, w_ref, b_ref, o_ref, acc_ref, *, compute_dtype):
    @pl.when(pl.program_id(2) == 0)
    def _():
        acc_ref[...] = jnp.zeros_like(acc_ref)

    x = x_ref[...]
    w = w_ref[...]
    if compute_dtype is not None:            # in-kernel cast (bf16 MXU path)
        x = x.astype(compute_dtype)
        w = w.astype(compute_dtype)
    acc_ref[...] += jnp.dot(x, w, preferred_element_type=jnp.float32)

    @pl.when(pl.program_id(2) == pl.num_programs(2) - 1)
    def _():
        o_ref[...] = (acc_ref[...] + b_ref[...].astype(jnp.float32)
                      ).astype(o_ref.dtype)


def linear(x2d, w, b, *, out_dtype=None, compute_dtype=None):
    """x2d: (M, K), w: (K, N) (torch weight transposed), b: (N,) -> (M, N)."""
    M, K = x2d.shape
    Kw, N = w.shape
    assert K == Kw
    out_dtype = out_dtype or x2d.dtype

    tm, Mp = _tile_and_pad(M, 512)           # mem-bound roofline ~85% at 512
    tn, Np = _tile_and_pad(N, 256)           # lane-dense output (mult of 128)
    tk, Kp = _tile_and_pad(K, 512)

    if (Mp, Kp) != (M, K):
        x2d = jnp.pad(x2d, ((0, Mp - M), (0, Kp - K)))
    if (Kp, Np) != (K, N):
        w = jnp.pad(w, ((0, Kp - K), (0, Np - N)))
    if Np != N:
        b = jnp.pad(b, (0, Np - N))

    grid = (Mp // tm, Np // tn, Kp // tk)
    out = pl.pallas_call(
        functools.partial(_linear_kernel, compute_dtype=compute_dtype),
        out_shape=jax.ShapeDtypeStruct((Mp, Np), out_dtype),
        grid_spec=pltpu.PrefetchScalarGridSpec(
            num_scalar_prefetch=0,
            grid=grid,
            in_specs=[
                pl.BlockSpec((tm, tk), lambda i, j, k: (i, k)),
                pl.BlockSpec((tk, tn), lambda i, j, k: (k, j)),
                pl.BlockSpec((1, tn), lambda i, j, k: (0, j)),
            ],
            out_specs=pl.BlockSpec((tm, tn), lambda i, j, k: (i, j)),
            scratch_shapes=[pltpu.VMEM((tm, tn), jnp.float32)],
        ),
        compiler_params=pltpu.CompilerParams(
            dimension_semantics=("parallel", "parallel", "arbitrary")),
    )(x2d, w, b.reshape(1, Np))

    if (Mp, Np) != (M, N):
        out = out[:M, :N]
    return out


# ---------------------------------------------------------------------------
# Fused attention (all heads) + head-merge + output projection, Q-tiled
# ---------------------------------------------------------------------------
def _attn_out_kernel(q_ref, kv_ref, wo_ref, bo_ref, o_ref, merged_ref, *,
                     n_heads, head_size, scale, compute_dtype):
    # q_ref  : (tq, 3*d_model)  query-tile rows of de-interleaved qkv
    #                           (Q block occupies columns [0, d_model))
    # kv_ref : (T , 3*d_model)  full-length rows (K at d_model, V at 2*d_model)
    # wo_ref : (d_model, d_model), bo_ref : (1, d_model)
    # merged_ref: VMEM scratch (tq, d_model) f32 — all heads' PV results.
    d_model = n_heads * head_size
    cast = ((lambda a: a.astype(compute_dtype)) if compute_dtype is not None
            else (lambda a: a))

    for h in range(n_heads):                         # unrolled over heads
        q = cast(q_ref[:, h * head_size:(h + 1) * head_size])         # (tq,hs)
        k = cast(kv_ref[:, d_model + h * head_size:
                         d_model + (h + 1) * head_size])              # (T, hs)
        v = kv_ref[:, 2 * d_model + h * head_size:
                   2 * d_model + (h + 1) * head_size]                 # (T, hs)

        # q @ k^T without materializing a transpose; f32 accumulation.
        s = lax.dot_general(q, k, (((1,), (1,)), ((), ())),
                            preferred_element_type=jnp.float32) * scale
        s = s - jnp.max(s, axis=-1, keepdims=True)
        p = jnp.exp(s)                                # unnormalized probs, f32
        l = jnp.sum(p, axis=-1, keepdims=True)        # (tq, 1)

        p_lhs = p if compute_dtype is None else p.astype(compute_dtype)
        pv = jnp.dot(p_lhs.astype(v.dtype) if compute_dtype is None else p_lhs,
                     cast(v), preferred_element_type=jnp.float32)     # (tq,hs)

        # Normalize AFTER the PV matmul: (tq, hs) multiply, not (tq, T).
        merged_ref[:, h * head_size:(h + 1) * head_size] = (
            pv * pl.reciprocal(l, approx=False))

    # Heads merged in VMEM -> single output-projection matmul + bias,
    # one lane-dense (tq, d_model) store.
    out = jnp.dot(cast(merged_ref[...]), cast(wo_ref[...]),
                  preferred_element_type=jnp.float32)
    o_ref[...] = (out + bo_ref[...].astype(jnp.float32)).astype(o_ref.dtype)


def fused_attention_out(qkv, w_out, b_out, n_heads, head_size, *,
                        out_dtype, compute_dtype=None):
    """qkv: (B, T, 3*d_model), de-interleaved columns -> (B, T, d_model)."""
    B, T, three_dm = qkv.shape
    d_model = n_heads * head_size
    assert three_dm == 3 * d_model

    tq, Tp = _tile_and_pad(T, 256)
    # Pad only the Q copy (padded query rows produce garbage rows that are
    # sliced off); K/V always come from the unpadded array so real queries
    # never attend to padded keys.
    qkv_q = qkv if Tp == T else jnp.pad(qkv, ((0, 0), (0, Tp - T), (0, 0)))

    kernel = functools.partial(
        _attn_out_kernel, n_heads=n_heads, head_size=head_size,
        scale=1.0 / (head_size ** 0.5), compute_dtype=compute_dtype)

    out = pl.pallas_call(
        kernel,
        out_shape=jax.ShapeDtypeStruct((B, Tp, d_model), out_dtype),
        grid=(B, Tp // tq),
        in_specs=[
            pl.BlockSpec((pl.Squeezed(), tq, three_dm), lambda b, i: (b, i, 0)),
            pl.BlockSpec((pl.Squeezed(), T, three_dm), lambda b, i: (b, 0, 0)),
            pl.BlockSpec((d_model, d_model), lambda b, i: (0, 0)),  # resident
            pl.BlockSpec((1, d_model), lambda b, i: (0, 0)),        # resident
        ],
        out_specs=pl.BlockSpec((pl.Squeezed(), tq, d_model),
                               lambda b, i: (b, i, 0)),
        scratch_shapes=[pltpu.VMEM((tq, d_model), jnp.float32)],
        compiler_params=pltpu.CompilerParams(
            dimension_semantics=("parallel", "parallel")),
    )(qkv_q, qkv, w_out, b_out.reshape(1, d_model))

    if Tp != T:
        out = out[:, :T, :]
    return out


# ---------------------------------------------------------------------------
# MultiHeadSA forward
# ---------------------------------------------------------------------------
def multi_head_sa(X, params, n_heads, d_model, mask=None, *, compute_dtype=None):
    # compute_dtype: set to jnp.bfloat16 on v6e/v7x for MXU peak (casts happen
    # inside the kernels; f32 accumulators kept).  None (f32) for the ref check.
    assert mask is None  # TODO(synk): additive attention-mask path
    B, T, C = X.shape
    head_size = d_model // n_heads
    out_dtype = X.dtype

    # De-interleave QKV weight columns once (torch layout groups per head as
    # [q_h|k_h|v_h]; reorder to [Q_all|K_all|V_all] so in-kernel Q/K/V bases
    # are d_model-aligned -> lane-aligned slices, no per-head relayout).
    idx = np.arange(3 * d_model).reshape(n_heads, 3, head_size)
    perm = np.transpose(idx, (1, 0, 2)).reshape(-1)
    w_qkv = params["w_qkv"][:, perm]
    b_qkv = params["b_qkv"][perm]

    # 1) QKV projection on the (B*T, C) slab.
    qkv = linear(X.reshape(B * T, C), w_qkv, b_qkv,
                 out_dtype=out_dtype, compute_dtype=compute_dtype)
    qkv = qkv.reshape(B, T, 3 * d_model)   # metadata-only split of leading dim

    # 2) Fused attention + head merge + output projection (lane-dense output).
    return fused_attention_out(qkv, params["w_out"], params["b_out"],
                               n_heads, head_size, out_dtype=out_dtype,
                               compute_dtype=compute_dtype)


# ---------------------------------------------------------------------------
# Pure-JAX reference (for correctness check only)
# ---------------------------------------------------------------------------
def multi_head_sa_ref(X, params, n_heads, d_model):
    B, T, C = X.shape
    head_size = d_model // n_heads
    qkv = X @ params["w_qkv"] + params["b_qkv"]
    qkv = qkv.reshape(B, T, n_heads, 3 * head_size)
    qkv = jnp.transpose(qkv, (0, 2, 1, 3))
    q, k, v = jnp.split(qkv, 3, axis=-1)
    s = jnp.einsum("bhqd,bhkd->bhqk", q, k) / (head_size ** 0.5)
    p = jax.nn.softmax(s, axis=-1)
    res = jnp.einsum("bhqk,bhkd->bhqd", p, v)
    res = jnp.transpose(res, (0, 2, 1, 3)).reshape(B, T, d_model)
    return res @ params["w_out"] + params["b_out"]


# ---------------------------------------------------------------------------
# Deterministic parameter init (PyTorch nn.Linear-style uniform bounds)
# ---------------------------------------------------------------------------
def init_params(key, input_dim, d_model):
    k1, k2, k3, k4 = jax.random.split(key, 4)
    bound_qkv = 1.0 / (input_dim ** 0.5)
    bound_out = 1.0 / (d_model ** 0.5)
    return {
        # stored as (in, out) so kernels compute x @ w + b  (== x @ W^T + b)
        "w_qkv": jax.random.uniform(k1, (input_dim, 3 * d_model),
                                    jnp.float32, -bound_qkv, bound_qkv),
        "b_qkv": jax.random.uniform(k2, (3 * d_model,),
                                    jnp.float32, -bound_qkv, bound_qkv),
        "w_out": jax.random.uniform(k3, (d_model, d_model),
                                    jnp.float32, -bound_out, bound_out),
        "b_out": jax.random.uniform(k4, (d_model,),
                                    jnp.float32, -bound_out, bound_out),
    }


if __name__ == "__main__":
    B, T, INPUT_DIM = 2, 8, 32
    N_HEADS, D_MODEL = 4, 32

    key = jax.random.PRNGKey(0)
    kx, kp = jax.random.split(key)
    X = jax.random.normal(kx, (B, T, INPUT_DIM), jnp.float32)
    params = init_params(kp, INPUT_DIM, D_MODEL)

    out = multi_head_sa(X, params, N_HEADS, D_MODEL)
    out = jax.block_until_ready(out)

    ref = multi_head_sa_ref(X, params, N_HEADS, D_MODEL)
    assert out.shape == (B, T, D_MODEL)
    assert jnp.allclose(out, ref, atol=2e-3, rtol=2e-3), "mismatch vs reference"

    print("KERNEL_OK")
</pallas_src>

<mosaic_0001>
module attributes {stable_mosaic.version = 11 : i64} {
  func.func @_linear_kernel(%arg0: i32, %arg1: i32, %arg2: i32, %arg3: memref<16x32xf32, #tpu.memory_space<vmem>>, %arg4: memref<32x96xf32, #tpu.memory_space<vmem>>, %arg5: memref<1x96xf32, #tpu.memory_space<vmem>>, %arg6: memref<16x96xf32, #tpu.memory_space<vmem>>, %arg7: memref<16x96xf32, #tpu.memory_space<vmem>>) attributes {dimension_semantics = [#tpu.dimension_semantics<parallel>, #tpu.dimension_semantics<parallel>, #tpu.dimension_semantics<arbitrary>], iteration_bounds = array<i64: 1, 1, 1>, scalar_prefetch = 0 : i64, scratch_operands = 1 : i64, tpu.core_type = #tpu.core_type<tc>, window_params = [{transform_indices = @transform_0, window_bounds = array<i64: 16, 32>}, {transform_indices = @transform_1, window_bounds = array<i64: 32, 96>}, {transform_indices = @transform_2, window_bounds = array<i64: 1, 96>}, {transform_indices = @transform_3, window_bounds = array<i64: 16, 96>}]} {
    %c0_i32 = arith.constant 0 : i32
    %0 = arith.cmpi eq, %arg2, %c0_i32 : i32
    %1 = arith.extui %0 : i1 to i32
    %c0_i32_0 = arith.constant 0 : i32
    %2 = arith.cmpi ne, %1, %c0_i32_0 : i32
    scf.if %2 {
      %cst_10 = arith.constant 0.000000e+00 : f32
      %12 = vector.broadcast %cst_10 : f32 to vector<16x96xf32>
      %c0_11 = arith.constant 0 : index
      %c0_12 = arith.constant 0 : index
      %13 = vector.load %arg7[%c0_11, %c0_12] : memref<16x96xf32, #tpu.memory_space<vmem>>, vector<16x96xf32>
      tpu.vector_store %arg7[%c0_11, %c0_12], %12 {strides = array<i32>} : memref<16x96xf32, #tpu.memory_space<vmem>>, vector<16x96xf32>,
    } else {
    }
    %c0 = arith.constant 0 : index
    %c0_1 = arith.constant 0 : index
    %3 = vector.load %arg3[%c0, %c0_1] : memref<16x32xf32, #tpu.memory_space<vmem>>, vector<16x32xf32>
    %c0_2 = arith.constant 0 : index
    %c0_3 = arith.constant 0 : index
    %4 = vector.load %arg4[%c0_2, %c0_3] : memref<32x96xf32, #tpu.memory_space<vmem>>, vector<32x96xf32>
    %c0_4 = arith.constant 0 : index
    %c0_5 = arith.constant 0 : index
    %5 = vector.load %arg7[%c0_4, %c0_5] : memref<16x96xf32, #tpu.memory_space<vmem>>, vector<16x96xf32>
    %cst = arith.constant dense<0.000000e+00> : vector<16x96xf32>
    %6 = tpu.matmul %3, %4, %cst {dimension_numbers = #tpu.dot_dimension_numbers<[1], [0], [0], [1], [0, 0, 1, 1], [], []>} : vector<16x32xf32>, vector<32x96xf32>, vector<16x96xf32> -> vector<16x96xf32>
    %7 = arith.addf %5, %6 : vector<16x96xf32>
    %c0_6 = arith.constant 0 : index
    %c0_7 = arith.constant 0 : index
    %8 = vector.load %arg7[%c0_6, %c0_7] : memref<16x96xf32, #tpu.memory_space<vmem>>, vector<16x96xf32>
    tpu.vector_store %arg7[%c0_6, %c0_7], %7 {strides = array<i32>} : memref<16x96xf32, #tpu.memory_space<vmem>>, vector<16x96xf32>,
    %c0_i32_8 = arith.constant 0 : i32
    %9 = arith.cmpi eq, %arg2, %c0_i32_8 : i32
    %10 = arith.extui %9 : i1 to i32
    %c0_i32_9 = arith.constant 0 : i32
    %11 = arith.cmpi ne, %10, %c0_i32_9 : i32
    scf.if %11 {
      %c0_10 = arith.constant 0 : index
      %c0_11 = arith.constant 0 : index
      %12 = vector.load %arg7[%c0_10, %c0_11] : memref<16x96xf32, #tpu.memory_space<vmem>>, vector<16x96xf32>
      %c0_12 = arith.constant 0 : index
      %c0_13 = arith.constant 0 : index
      %13 = vector.load %arg5[%c0_12, %c0_13] : memref<1x96xf32, #tpu.memory_space<vmem>>, vector<1x96xf32>
      %14 = vector.broadcast %13 : vector<1x96xf32> to vector<16x96xf32>
      %15 = arith.addf %12, %14 : vector<16x96xf32>
      %c0_14 = arith.constant 0 : index
      %c0_15 = arith.constant 0 : index
      %16 = vector.load %arg6[%c0_14, %c0_15] : memref<16x96xf32, #tpu.memory_space<vmem>>, vector<16x96xf32>
      tpu.vector_store %arg6[%c0_14, %c0_15], %15 {strides = array<i32>} : memref<16x96xf32, #tpu.memory_space<vmem>>, vector<16x96xf32>,
    } else {
    }
    return
  }
  func.func @transform_0(%arg0: i32, %arg1: i32, %arg2: i32) -> (i32, i32) {
    %c0_i32 = arith.constant 0 : i32
    return %arg0, %arg2 : i32, i32
  }
  func.func @transform_1(%arg0: i32, %arg1: i32, %arg2: i32) -> (i32, i32) {
    %c0_i32 = arith.constant 0 : i32
    return %arg2, %arg1 : i32, i32
  }
  func.func @transform_2(%arg0: i32, %arg1: i32, %arg2: i32) -> (i32, i32) {
    %c0_i32 = arith.constant 0 : i32
    %c0_i32_0 = arith.constant 0 : i32
    return %c0_i32, %arg1 : i32, i32
  }
  func.func @transform_3(%arg0: i32, %arg1: i32, %arg2: i32) -> (i32, i32) {
    %c0_i32 = arith.constant 0 : i32
    return %arg0, %arg1 : i32, i32
  }
}

</mosaic_0001>

<bundles_post_ra>
// kernel: tpu_custom_call.1
= control target key start
LH: loop header
LB: loop body
LE: loop exit
PB: predicated region body
PF: predicated region fallthrough
CT: control target
= control target key end

     0   :  { %8 = vsyncpa [#allocation4], 0  ;;  %s274_s0 = inlined_call_operand.hbm [shape: f32[16,32], index: 0, kind: input, shape index: {}]   ;;  %s275_s1 = inlined_call_operand.hbm [shape: f32[32,96], index: 1, kind: input, shape index: {}]   ;;  %s276_s2 = inlined_call_operand.vmem [shape: f32[1,96], index: 2, kind: input, shape index: {}]   ;;  %s277_s3 = inlined_call_operand.hbm [shape: f32[16,96], index: 3, kind: output, shape index: {}]  }
   0x1   :  { %9 = vsyncpa [#allocation7], 0 }
   0x2   :  { %10 = vsyncpa [#allocation5], 0  ;;  %s15_s14 = sshll.u32 %s274_s0, 4  ;;  %s221_s15 = smov [#allocation3]   ;;  %s16_s14 = int_to_ptr.hbm [resolvable:$true] %s15_s14 }
   0x3   :  { %s17_s16 = sshll.u32 %s221_s15, 4  ;;  %s28_s19 = sshll.u32 %s275_s1, 4  ;;  %s18_s16 = int_to_ptr.vmem [resolvable:$true] %s17_s16  ;;  %s29_s19 = int_to_ptr.hbm [resolvable:$true] %s28_s19 }
   0x4   :  { %s222_s20 = smov 128   ;;  %s223_s21 = smov 8  }
   0x5   :  { %23 = dma.hbm_to_vmem [thread:$0]  %s16_s14, 256, %s18_s16, [#allocation4], %s222_s20, %s222_s20, %s223_s21  }
   0x6   :  { %s224_s22 = smov [#allocation6]  }
   0x7   :  { %s30_s23 = sshll.u32 %s224_s22, 4  ;;  %s31_s23 = int_to_ptr.vmem [resolvable:$true] %s30_s23 }
   0x8   :  { %36 = dma.hbm_to_vmem [thread:$0]  %s29_s19, 512, %s31_s23, [#allocation7], %s222_s20, %s222_s20, %s223_s21  }
   0x9   :  { %215 = dma.done.wait [#allocation4], 256  }
   0xa   :  { %216 = vsyncadd [#allocation4], 4294967040 }
   0xb   :  { %217 = dma.done.wait [#allocation7], 512  }
   0xc   :  { %218 = vsyncadd [#allocation7], 4294966784  ;;  %vm51_vm0 = vcmask 785408   ;;  %v225_v0 = vmov 0.0   ;;  %v59_v1 = vld [vmem:[#allocation6 + $0x18] sm:$0xff]  ;;  %v58_v2 = vld [vmem:[#allocation6 + $0x10] sm:$0xff] }
   0xd   :  { %52 = vst.msk [vmem:[#allocation2] sm:$0xff] %vm51_vm0, %v225_v0  ;;  %81 = vmatpush.msra.mxu0 %v59_v1  ;;  %132 = vmatpush.msra.mxu1 %v59_v1  ;;  %v57_v3 = vld [vmem:[#allocation6 + $0x8] sm:$0xff]  ;;  %v56_v4 = vld [vmem:[#allocation6] sm:$0xff]  ;;  %v54_v5 = vld [vmem:[#allocation3] sm:$0xff]  ;;  %vm62_vm1 = vcmask 261120   ;;  %s226_s24 = smov [#allocation8]  }
   0xe   :  { %53 = vst.msk [vmem:[#allocation2 + $0x8] sm:$0xff] %vm51_vm0, %v225_v0  ;;  %v55_v6 = vld [vmem:[#allocation3 + $0x8] sm:$0xff]  ;;  %v142_v13 = vld [vmem:[%s276_s2] ss:$0 sm:$0xff]  ;;  %s114_s25 = sshll.u32 %s226_s24, 4  ;;  %s116_s28 = sshll.u32 %s277_s3, 4  ;;  %s115_s25 = int_to_ptr.vmem [resolvable:$true] %s114_s25  ;;  %s117_s28 = int_to_ptr.hbm [resolvable:$true] %s116_s28 }
   0xf   :  { %82 = vmatpush.msra.mxu0 %v58_v2  ;;  %133 = vmatpush.msra.mxu1 %v58_v2 }
  0x11   :  { %83 = vmatpush.msra.mxu0 %v57_v3  ;;  %134 = vmatpush.msra.mxu1 %v57_v3 }
  0x13   :  { %84 = vmatpush.msra.mxu0 %v56_v4  ;;  %135 = vmatpush.msra.mxu1 %v56_v4 }
  0x14   :  { %130 = vmatmul.msk.f32.vlgmr.msra.gmra.mxu0 %vm62_vm1, %v54_v5  ;;  %131 = vmatmul.msk.f32.vlgmr.msra.gmra.mxu1 %vm62_vm1, %v55_v6  ;;  %v60_v7 = vld [vmem:[#allocation2] sm:$0xff] }
  0x15   :  { %v61_v8 = vld [vmem:[#allocation2 + $0x8] sm:$0xff] }
  0x91   :  { %v86_v9 = vpop.f32.mrf.mxu0  ;;  %v89_v10 = vpop.f32.mrf.mxu1 }
  0x92   :  { %v92_v11 = vadd.f32 %v86_v9, %v60_v7  ;;  %v93_v12 = vadd.f32 %v89_v10, %v61_v8 }
  0x94   :  { %95 = vst.msk [vmem:[#allocation2] sm:$0xff] %vm51_vm0, %v92_v11 }
  0x95   :  { %96 = vst.msk [vmem:[#allocation2 + $0x8] sm:$0xff] %vm51_vm0, %v93_v12 }
  0x9b   :  { %v100_v14 = vld [vmem:[#allocation2] sm:$0xff] }
  0x9c   :  { %v101_v15 = vld [vmem:[#allocation2 + $0x8] sm:$0xff]  ;;  %v106_v16 = vadd.f32 %v142_v13, %v100_v14 }
  0x9d   :  { %v107_v17 = vadd.f32 %v142_v13, %v101_v15 }
  0x9e   :  { %108 = vst.msk [vmem:[#allocation8] sm:$0xff] %vm51_vm0, %v106_v16 }
  0x9f   :  { %109 = vst.msk [vmem:[#allocation8 + $0x8] sm:$0xff] %vm51_vm0, %v107_v17 }
  0xa0   :  { %122 = dma.vmem_to_hbm [thread:$0]  %s115_s25, 256, %s117_s28, [#allocation5], %s222_s20, %s222_s20, %s223_s21  }
  0xa1   :  { %219 = dma.done.wait [#allocation5], 256  }
  0xa2   :  { %220 = vsyncadd [#allocation5], 4294967040 }
  0xa3   :  { %127 = vsyncpa [#allocation4], 1 }
  0xa4   :  { %128 = vsyncpa [#allocation7], 1 }
  0xa5   :  { %129 = vsyncpa [#allocation5], 1 }

</bundles_post_ra>
